<compile_context>
chip_gen: v7x
topology: tpu7x:2x2x1
jax: 0.10.0
libtpu: 0.0.40
codegen_flags: <defaults>
</compile_context>

<pallas_src>
import functools

import jax
import jax.numpy as jnp
from jax.experimental import pallas as pl
from jax.experimental.pallas import tpu as pltpu


def _cdiv(a: int, b: int) -> int:
    return (a + b - 1) // b


def _round_up(x: int, m: int) -> int:
    return (x + m - 1) // m * m


def _vmem_capacity_bytes() -> int:
    """Per-TensorCore VMEM capacity; conservative fallback if query fails."""
    try:
        return int(pltpu.get_tpu_info().vmem_capacity_bytes)
    except Exception:
        return 64 << 20  # v7x-safe default


def _select_tiles(M, K, N, in_bytes, out_bytes, vmem_budget, x_buffers):
    """Pick (tm, tk, tiled_k) so everything fits the per-core VMEM budget."""
    # --- Row tile ---
    if M <= 256:
        tm = M  # single row block; full-dim block shape is always legal
    else:
        tm_target = 2048 if vmem_budget >= (80 << 20) else 1024  # v5e/v6e vs v7x
        # Guarantee grid_m >= 2 so both v7x TensorCores get work.
        tm = min(tm_target, _round_up(_cdiv(M, 2), 256))

    def vmem_need(tm_, tk_, tiled_k):
        return (x_buffers * tm_ * tk_ * in_bytes      # x blocks
                + 2 * tk_ * N * in_bytes              # weight blocks
                + 2 * tm_ * N * out_bytes             # output blocks
                + 2 * N * 4                           # bias
                + (tm_ * N * 4 if tiled_k else 0))    # f32 accumulator scratch

    # --- Prefer single-block K: weight resident, 1-D grid, no accumulator ---
    while tm > 256 and vmem_need(tm, K, False) > vmem_budget:
        tm = max(256, _round_up(tm // 2, 256))
    if vmem_need(tm, K, False) <= vmem_budget:
        return tm, K, False

    # --- Fallback: tile the reduction axis (rare; very large n_dim) ---
    tk = _round_up(K, 128)
    while tk > 512 and vmem_need(tm, tk, True) > vmem_budget:
        tk = max(512, _round_up(tk // 2, 128))
    return tm, tk, True


def _linear_kernel_resident(x_ref, w_ref, b_ref, o_ref):
    # Whole reduction dim in one block: weight stays VMEM-resident across the
    # 1-D row grid; bias add rides the free VPU slot under the MXU.
    o_ref[...] = (
        jnp.dot(x_ref[...], w_ref[...], preferred_element_type=jnp.float32)
        + b_ref[...]
    ).astype(o_ref.dtype)


def _linear_kernel_ktiled(x_ref, w_ref, b_ref, o_ref, acc_ref, *, valid_k, tk):
    # x_ref: (tm, tk)  w_ref: (tk, 128)  b_ref: (1, 128)
    # o_ref: (tm, 128) acc_ref: (tm, 128) f32 scratch (persists over K axis)
    k = pl.program_id(1)

    @pl.when(k == 0)
    def _():
        acc_ref[...] = jnp.zeros_like(acc_ref)

    x = x_ref[...]
    w = w_ref[...]
    if valid_k % tk != 0:
        # Zero the ragged K tail in-kernel (cheap VPU work) instead of paying a
        # wrapper-side jnp.pad pass over x in HBM.
        rem = valid_k - k * tk
        kcol = jax.lax.broadcasted_iota(jnp.int32, x.shape, 1)
        x = jnp.where(kcol < rem, x, 0)
        krow = jax.lax.broadcasted_iota(jnp.int32, w.shape, 0)
        w = jnp.where(krow < rem, w, 0)

    acc_ref[...] += jnp.dot(x, w, preferred_element_type=jnp.float32)

    @pl.when(k == pl.num_programs(1) - 1)
    def _():
        o_ref[...] = (acc_ref[...] + b_ref[...]).astype(o_ref.dtype)


def transformation_layer(x, w_t, b, *, x_buffers=2):
    """Forward pass of TransformationLayer.

    x:   (M, n_dim)     (pass bf16 x/w_t for the HBM-bound large-batch case;
    w_t: (n_dim, 128)    accumulation is f32 either way)
    b:   (128,)
    Returns (M, 128) in x.dtype.
    """
    M, K = x.shape
    Kw, N = w_t.shape
    assert K == Kw, (K, Kw)
    out_dtype = x.dtype

    in_bytes = jnp.dtype(x.dtype).itemsize
    out_bytes = jnp.dtype(out_dtype).itemsize

    vmem_cap = _vmem_capacity_bytes()
    vmem_budget = int(vmem_cap * 0.8)  # per-TC; leave compiler headroom

    tm, tk, tiled_k = _select_tiles(M, K, N, in_bytes, out_bytes,
                                    vmem_budget, x_buffers)
    grid_m = _cdiv(M, tm)

    b2 = b.reshape(1, N).astype(jnp.float32)

    x_spec_kw = {}
    if x_buffers != 2:
        # Sweepable pipeline depth on the x stream (e.g. 3 on v7x).
        x_spec_kw["pipeline_mode"] = pl.Buffered(x_buffers)

    need = (x_buffers * tm * tk * in_bytes + 2 * tk * N * in_bytes
            + 2 * tm * N * out_bytes + 2 * N * 4
            + (tm * N * 4 if tiled_k else 0))
    vmem_limit_bytes = int(min(vmem_budget, max(2 * need, 32 << 20)))

    if not tiled_k:
        grid = (grid_m,)
        kernel = _linear_kernel_resident
        in_specs = [
            pl.BlockSpec((tm, K), lambda i: (i, 0), **x_spec_kw),   # x row tile
            pl.BlockSpec((K, N), lambda i: (0, 0)),                 # weight (resident)
            pl.BlockSpec((1, N), lambda i: (0, 0)),                 # bias
        ]
        out_specs = pl.BlockSpec((tm, N), lambda i: (i, 0))
        scratch_shapes = []
        dims = ("parallel",)
    else:
        grid_k = _cdiv(K, tk)
        grid = (grid_m, grid_k)
        kernel = functools.partial(_linear_kernel_ktiled, valid_k=K, tk=tk)
        in_specs = [
            pl.BlockSpec((tm, tk), lambda i, k: (i, k), **x_spec_kw),
            pl.BlockSpec((tk, N), lambda i, k: (k, 0)),
            pl.BlockSpec((1, N), lambda i, k: (0, 0)),
        ]
        out_specs = pl.BlockSpec((tm, N), lambda i, k: (i, 0))
        scratch_shapes = [pltpu.VMEM((tm, N), jnp.float32)]
        dims = ("parallel", "arbitrary")

    return pl.pallas_call(
        kernel,
        out_shape=jax.ShapeDtypeStruct((M, N), out_dtype),
        grid_spec=pltpu.PrefetchScalarGridSpec(
            num_scalar_prefetch=0,
            grid=grid,
            in_specs=in_specs,
            out_specs=out_specs,
            scratch_shapes=scratch_shapes,
        ),
        compiler_params=pltpu.CompilerParams(
            dimension_semantics=dims,
            vmem_limit_bytes=vmem_limit_bytes,
        ),
    )(x, w_t, b2)


def init_params(key, n_dim, n_out=128):
    """Deterministic init matching nn.Linear's Kaiming-uniform defaults."""
    kw, kb = jax.random.split(key)
    bound = 1.0 / jnp.sqrt(jnp.float32(n_dim))
    # PyTorch weight is (n_out, n_dim); store transposed (n_dim, n_out).
    w = jax.random.uniform(kw, (n_out, n_dim), jnp.float32, -bound, bound)
    b = jax.random.uniform(kb, (n_out,), jnp.float32, -bound, bound)
    return w.T, b


if __name__ == "__main__":
    key = jax.random.PRNGKey(0)
    k_x, k_p = jax.random.split(key)

    n_dim = 32
    batch = 8  # not a tile multiple -> exercises the ragged-row-block path
    x = jax.random.normal(k_x, (batch, n_dim), jnp.float32)
    w_t, b = init_params(k_p, n_dim)

    fwd = jax.jit(transformation_layer)

    # f32 path (default), tight tolerance.
    out = jax.block_until_ready(fwd(x, w_t, b))
    ref = x @ w_t + b[None, :]
    assert out.shape == (batch, 128), out.shape
    assert jnp.allclose(out, ref, atol=1e-5, rtol=1e-5)

    # bf16 streaming path (caller provides bf16 operands; f32 accumulation).
    x_bf = x.astype(jnp.bfloat16)
    w_bf = w_t.astype(jnp.bfloat16)
    out_bf = jax.block_until_ready(fwd(x_bf, w_bf, b))
    ref_bf = x_bf.astype(jnp.float32) @ w_bf.astype(jnp.float32) + b[None, :]
    assert out_bf.shape == (batch, 128), out_bf.shape
    assert jnp.allclose(out_bf.astype(jnp.float32), ref_bf, atol=5e-2, rtol=5e-2)

    print("KERNEL_OK")
</pallas_src>

<mosaic_0001>
module attributes {stable_mosaic.version = 11 : i64} {
  func.func @_linear_kernel_resident(%arg0: i32, %arg1: memref<8x32xf32, #tpu.memory_space<vmem>>, %arg2: memref<32x128xf32, #tpu.memory_space<vmem>>, %arg3: memref<1x128xf32, #tpu.memory_space<vmem>>, %arg4: memref<8x128xf32, #tpu.memory_space<vmem>>) attributes {dimension_semantics = [#tpu.dimension_semantics<parallel>], iteration_bounds = array<i64: 1>, scalar_prefetch = 0 : i64, scratch_operands = 0 : i64, tpu.core_type = #tpu.core_type<tc>, window_params = [{transform_indices = @transform_0, window_bounds = array<i64: 8, 32>}, {pipeline_mode = #tpu.pipeline_mode<synchronous>, transform_indices = @transform_1, window_bounds = array<i64: 32, 128>}, {pipeline_mode = #tpu.pipeline_mode<synchronous>, transform_indices = @transform_2, window_bounds = array<i64: 1, 128>}, {transform_indices = @transform_3, window_bounds = array<i64: 8, 128>}]} {
    %c0 = arith.constant 0 : index
    %c0_0 = arith.constant 0 : index
    %0 = vector.load %arg1[%c0, %c0_0] : memref<8x32xf32, #tpu.memory_space<vmem>>, vector<8x32xf32>
    %c0_1 = arith.constant 0 : index
    %c0_2 = arith.constant 0 : index
    %1 = vector.load %arg2[%c0_1, %c0_2] : memref<32x128xf32, #tpu.memory_space<vmem>>, vector<32x128xf32>
    %cst = arith.constant dense<0.000000e+00> : vector<8x128xf32>
    %2 = tpu.matmul %0, %1, %cst {dimension_numbers = #tpu.dot_dimension_numbers<[1], [0], [0], [1], [0, 0, 1, 1], [], []>} : vector<8x32xf32>, vector<32x128xf32>, vector<8x128xf32> -> vector<8x128xf32>
    %c0_3 = arith.constant 0 : index
    %c0_4 = arith.constant 0 : index
    %3 = vector.load %arg3[%c0_3, %c0_4] : memref<1x128xf32, #tpu.memory_space<vmem>>, vector<1x128xf32>
    %4 = vector.broadcast %3 : vector<1x128xf32> to vector<8x128xf32>
    %5 = arith.addf %2, %4 : vector<8x128xf32>
    %c0_5 = arith.constant 0 : index
    %c0_6 = arith.constant 0 : index
    %6 = vector.load %arg4[%c0_5, %c0_6] : memref<8x128xf32, #tpu.memory_space<vmem>>, vector<8x128xf32>
    tpu.vector_store %arg4[%c0_5, %c0_6], %5 {strides = array<i32>} : memref<8x128xf32, #tpu.memory_space<vmem>>, vector<8x128xf32>,
    return
  }
  func.func @transform_0(%arg0: i32) -> (i32, i32) {
    %c0_i32 = arith.constant 0 : i32
    %c0_i32_0 = arith.constant 0 : i32
    return %arg0, %c0_i32 : i32, i32
  }
  func.func @transform_1(%arg0: i32) -> (i32, i32) {
    %c0_i32 = arith.constant 0 : i32
    %c0_i32_0 = arith.constant 0 : i32
    %c0_i32_1 = arith.constant 0 : i32
    return %c0_i32, %c0_i32_0 : i32, i32
  }
  func.func @transform_2(%arg0: i32) -> (i32, i32) {
    %c0_i32 = arith.constant 0 : i32
    %c0_i32_0 = arith.constant 0 : i32
    %c0_i32_1 = arith.constant 0 : i32
    return %c0_i32, %c0_i32_0 : i32, i32
  }
  func.func @transform_3(%arg0: i32) -> (i32, i32) {
    %c0_i32 = arith.constant 0 : i32
    %c0_i32_0 = arith.constant 0 : i32
    return %arg0, %c0_i32 : i32, i32
  }
}

</mosaic_0001>

<bundles_post_ra>
// kernel: transformation_layer.1
= control target key start
LH: loop header
LB: loop body
LE: loop exit
PB: predicated region body
PF: predicated region fallthrough
CT: control target
= control target key end

     0   :  { %8 = vsyncpa [#allocation3], 0  ;;  %s322_s0 = inlined_call_operand.hbm [shape: f32[8,32], index: 0, kind: input, shape index: {}]   ;;  %s323_s1 = inlined_call_operand.hbm [shape: f32[32,128], index: 1, kind: input, shape index: {}]   ;;  %s324_s2 = inlined_call_operand.vmem [shape: f32[1,128], index: 2, kind: input, shape index: {}]   ;;  %s325_s3 = inlined_call_operand.hbm [shape: f32[8,128], index: 3, kind: output, shape index: {}]  }
   0x1   :  { %9 = vsyncpa [#allocation6], 0 }
   0x2   :  { %10 = vsyncpa [#allocation4], 0  ;;  %s248_s12 = smov [#allocation2]   ;;  %s249_s14 = smov [#allocation5]  }
   0x3   :  { %s17_s13 = sshll.u32 %s248_s12, 4  ;;  %s26_s15 = sshll.u32 %s249_s14, 4  ;;  %s18_s13 = int_to_ptr.vmem [resolvable:$true] %s17_s13  ;;  %s276_s15 = int_to_ptr.vmem [resolvable:$true] %s26_s15 }
   0x4   :  { %s176_s18 = scalar_lea.hbm %s322_s0, 128 }
   0x5   :  { %p177_p0 = scmp.ne.s32.totalorder %s322_s0, %s176_s18  ;;  %p180_p1 = scmp.lt.u32.totalorder %s176_s18, %s322_s0 }
   0x7   :  { %p182_p2 = pnand %p180_p1, %p177_p0 }
   0x9   :  { %185 = shalt.err (!%p182_p2)
}
   0xa   :  { %s186_s23 = scalar_lea.vmem %s18_s13, 128  ;;  %p191_p4 = scmp.lt.s32.totalorder %s18_s13, %s18_s13 }
   0xb   :  { %p187_p3 = scmp.ne.s32.totalorder %s18_s13, %s186_s23  ;;  %p192_p5 = scmp.lt.s32.totalorder %s186_s23, %s186_s23 }
   0xd   :  { %p193_p6 = por %p192_p5, %p191_p4 }
   0xf   :  { %p194_p7 = pnand %p193_p6, %p187_p3 }
  0x11   :  { %197 = shalt.err (!%p194_p7)
}
  0x12   :  { %20 = dma.hbm_to_vmem [thread:$0]  %s322_s0, 128, %s18_s13, [#allocation3]  }
  0x13   :  { %s198_s28 = scalar_lea.hbm %s323_s1, 512 }
  0x14   :  { %p199_p8 = scmp.ne.s32.totalorder %s323_s1, %s198_s28  ;;  %p202_p9 = scmp.lt.u32.totalorder %s198_s28, %s323_s1 }
  0x16   :  { %p204_p10 = pnand %p202_p9, %p199_p8 }
  0x18   :  { %207 = shalt.err (!%p204_p10)
}
  0x19   :  { %s208_s6 = scalar_lea.vmem %s276_s15, 512  ;;  %p213_p12 = scmp.lt.s32.totalorder %s276_s15, %s276_s15 }
  0x1a   :  { %p209_p11 = scmp.ne.s32.totalorder %s276_s15, %s208_s6  ;;  %p214_p13 = scmp.lt.s32.totalorder %s208_s6, %s208_s6 }
  0x1c   :  { %p215_p0 = por %p214_p13, %p213_p12 }
  0x1e   :  { %p216_p1 = pnand %p215_p0, %p209_p11 }
  0x20   :  { %219 = shalt.err (!%p216_p1)
}
  0x21   :  { %s250_s0 = smov 128   ;;  %s251_s7 = smov 8  }
  0x22   :  { %32 = dma.hbm_to_vmem [thread:$0]  %s323_s1, 512, %s276_s15, [#allocation6], %s250_s0, %s250_s0, %s251_s7  }
  0x23   :  { %242 = dma.done.wait [#allocation3], 128  }
  0x24   :  { %243 = vsyncadd [#allocation3], 4294967168 }
  0x25   :  { %244 = dma.done.wait [#allocation6], 512  }
  0x26   :  { %245 = vsyncadd [#allocation6], 4294966784  ;;  %v252_v0 = vmov 0.0|0.0   ;;  %vm253_vm0 = vmmov 0   ;;  %v254_v1 = vmov 0.0   ;;  %v42_v2 = vld [vmem:[#allocation5] sm:$0xff] }
  0x27   :  { %162 = vmatprep.subr.bf16.mxu0 %v252_v0  ;;  %159 = vmatprep.mubr.msk.f32.mxu0 %vm253_vm0, %v254_v1  ;;  %v43_v3 = vld [vmem:[#allocation5 + $0x8] sm:$0xff]  ;;  %v44_v4 = vld [vmem:[#allocation5 + $0x10] sm:$0xff]  ;;  %v45_v6 = vld [vmem:[#allocation5 + $0x18] sm:$0xff]  ;;  %vm53_vm1 = vcmask 261120   ;;  %s255_s11 = smov [#allocation7]  }
  0x28   :  { %v163_v5 = vpack.c.bf16 %v43_v3, %v42_v2  ;;  %v166_v7 = vpack.c.bf16 %v45_v6, %v44_v4  ;;  %v41_v8 = vld [vmem:[#allocation2] sm:$0xff]  ;;  %s134_s12 = sshll.u32 %s255_s11, 4  ;;  %s135_s12 = int_to_ptr.vmem [resolvable:$true] %s134_s12 }
  0x29   :  { %v144_v9 = vld [vmem:[%s324_s2] ss:$0 sm:$0xff]  ;;  %s220_s13 = scalar_lea.vmem %s135_s12, 128  ;;  %p225_p3 = scmp.lt.s32.totalorder %s135_s12, %s135_s12 }
  0x2a   :  { %164 = vmatpush3.bf16.msra.mxu0 %v163_v5  ;;  %p221_p2 = scmp.ne.s32.totalorder %s135_s12, %s220_s13  ;;  %p226_p4 = scmp.lt.s32.totalorder %s220_s13, %s220_s13 }
  0x2b   :  { %165 = vmatprep.subr.bf16.mxu0 %v252_v0 }
  0x2c   :  { %p227_p5 = por %p226_p4, %p225_p3 }
  0x2e   :  { %167 = vmatpush3.bf16.msra.mxu0 %v166_v7  ;;  %p228_p6 = pnand %p227_p5, %p221_p2 }
  0x31   :  { %160 = vmatmul.mubr.msk.f32.vlgmr.msra.gmra.mrb[0].mxu0 %vm53_vm1, %v41_v8 }
 0x104   :  { %v123_v10 = vpop.f32.mrb[0].mxu0 }
 0x105   :  { %v124_v11 = vadd.f32 %v144_v9, %v123_v10  ;;  %v161_v12 = vpop.f32.mrb[1].mxu0 }
 0x107   :  { %127 = vst [vmem:[#allocation7] sm:$0xff] %v124_v11 }
 0x108   :  { %231 = shalt.err (!%p228_p6)
}
 0x109   :  { %s232_s16 = scalar_lea.hbm %s325_s3, 128 }
 0x10a   :  { %p233_p7 = scmp.ne.s32.totalorder %s325_s3, %s232_s16  ;;  %p236_p8 = scmp.lt.u32.totalorder %s232_s16, %s325_s3 }
 0x10c   :  { %p238_p9 = pnand %p236_p8, %p233_p7 }
 0x10e   :  { %241 = shalt.err (!%p238_p9)
}
 0x10f   :  { %137 = dma.vmem_to_hbm [thread:$0]  %s135_s12, 128, %s325_s3, [#allocation4]  }
 0x110   :  { %246 = dma.done.wait [#allocation4], 128  }
 0x111   :  { %247 = vsyncadd [#allocation4], 4294967168 }
 0x112   :  { %141 = vsyncpa [#allocation3], 1 }
 0x113   :  { %142 = vsyncpa [#allocation6], 1 }
 0x114   :  { %143 = vsyncpa [#allocation4], 1 }

</bundles_post_ra>
